<compile_context>
chip_gen: v6e
topology: v6e:2x2x1
jax: 0.10.0
libtpu: 0.0.40
codegen_flags: <defaults>
</compile_context>

<pallas_src>
import functools

import jax
import jax.numpy as jnp
from jax import lax
from jax.experimental import pallas as pl
from jax.experimental.pallas import tpu as pltpu


_NEG_FILL = -1e30  # fill for padded vocab columns; exp(_NEG_FILL - m) == 0


def _round_up(x, m):
    return (x + m - 1) // m * m


# ---------------------------------------------------------------------------
# Kernels
# ---------------------------------------------------------------------------
def _gather_rows(idx_sref, table_ref, logits_ref, *, tile_rows):
    """Copy the embedding rows selected by the SMEM-prefetched indices."""
    base = pl.program_id(0) * tile_rows

    def body(r, carry):
        tok = idx_sref[base + r]                                   # SMEM scalar read
        logits_ref[pl.ds(r, 1), :] = table_ref[pl.ds(tok, 1), :]   # (1, V_pad) row copy
        return carry

    lax.fori_loop(0, tile_rows, body, 0, unroll=8)


def _logits_kernel(idx_sref, table_ref, logits_ref, *, tile_rows):
    _gather_rows(idx_sref, table_ref, logits_ref, tile_rows=tile_rows)


def _loss_kernel(idx_sref, tgt_ref, table_ref, logits_ref, nll_ref, *, tile_rows):
    _gather_rows(idx_sref, table_ref, logits_ref, tile_rows=tile_rows)

    logits = logits_ref[...]                                       # (TN, V_pad) f32
    tn, v_pad = logits.shape
    tgt = tgt_ref[...]                                             # (TN, 1) int32
    col = lax.broadcasted_iota(jnp.int32, (tn, v_pad), 1)

    m = jnp.max(logits, axis=-1, keepdims=True)
    lse = jnp.log(jnp.sum(jnp.exp(logits - m), axis=-1, keepdims=True)) + m
    # select instead of a second materialized one-hot (saves a (TN, V) temp)
    tgt_logit = jnp.sum(jnp.where(col == tgt, logits, 0.0), axis=-1, keepdims=True)
    nll_ref[...] = lse - tgt_logit           # per-row NLL; wrapper masks pad + averages


# ---------------------------------------------------------------------------
# Host-side helpers
# ---------------------------------------------------------------------------
def _prep(idx, table, tile_rows):
    """Flatten/pad indices, pad vocab lanes to a multiple of 128."""
    B, T = idx.shape
    v_rows, V = table.shape
    N = B * T

    tn = tile_rows if tile_rows is not None else (512 if N >= 512 else _round_up(N, 8))
    tn = max(8, _round_up(int(tn), 8))
    n_pad = _round_up(N, tn)
    v_pad = _round_up(V, 128)

    idx_flat = jnp.zeros((n_pad,), jnp.int32).at[:N].set(
        idx.reshape(-1).astype(jnp.int32))

    if v_pad != V:
        table_p = jnp.full((v_rows, v_pad), _NEG_FILL, jnp.float32)
        table_p = table_p.at[:, :V].set(table.astype(jnp.float32))
    else:
        table_p = table.astype(jnp.float32)

    return idx_flat, table_p, N, n_pad, tn, V, v_pad, v_rows


def _compiler_params(tn, v_pad, v_rows):
    footprint = (v_rows * v_pad * 4          # resident embedding table
                 + 2 * tn * v_pad * 4        # double-buffered logits tile
                 + 4 * tn * 4                # targets + nll tiles (double-buffered)
                 + (2 << 20))                # headroom for internal scratch
    limit = int(min(64 << 20, max(32 << 20, footprint)))
    return pltpu.CompilerParams(
        dimension_semantics=("parallel",),   # no cross-tile state -> v7x 2-core OK
        vmem_limit_bytes=limit,
    )


@functools.partial(jax.jit, static_argnames=("tile_rows",))
def _nlm_loss_impl(idx, targets, table, tile_rows=None):
    idx_flat, table_p, N, n_pad, tn, V, v_pad, v_rows = _prep(idx, table, tile_rows)
    tgt_col = jnp.zeros((n_pad, 1), jnp.int32).at[:N, 0].set(
        targets.reshape(-1).astype(jnp.int32))
    num_tiles = n_pad // tn

    logits_pad, nll = pl.pallas_call(
        functools.partial(_loss_kernel, tile_rows=tn),
        out_shape=(
            jax.ShapeDtypeStruct((n_pad, v_pad), jnp.float32),
            jax.ShapeDtypeStruct((n_pad, 1), jnp.float32),
        ),
        grid_spec=pltpu.PrefetchScalarGridSpec(
            num_scalar_prefetch=1,                                   # idx -> SMEM
            grid=(num_tiles,),
            in_specs=[
                pl.BlockSpec((tn, 1), lambda i, idx_s: (i, 0)),          # targets
                pl.BlockSpec((v_rows, v_pad), lambda i, idx_s: (0, 0)),  # table (resident)
            ],
            out_specs=(
                pl.BlockSpec((tn, v_pad), lambda i, idx_s: (i, 0)),      # logits tile
                pl.BlockSpec((tn, 1), lambda i, idx_s: (i, 0)),          # per-row NLL
            ),
        ),
        compiler_params=_compiler_params(tn, v_pad, v_rows),
    )(idx_flat, tgt_col, table_p)

    logits = logits_pad[:N, :V]                 # (B*T, V) — matches .view(b*t, c)
    loss = jnp.mean(nll[:N, 0])                 # padded rows excluded; divisor = real N
    return logits, loss


@functools.partial(jax.jit, static_argnames=("tile_rows",))
def _nlm_logits_impl(idx, table, tile_rows=None):
    B, T = idx.shape
    idx_flat, table_p, N, n_pad, tn, V, v_pad, v_rows = _prep(idx, table, tile_rows)
    num_tiles = n_pad // tn

    logits_pad = pl.pallas_call(
        functools.partial(_logits_kernel, tile_rows=tn),
        out_shape=jax.ShapeDtypeStruct((n_pad, v_pad), jnp.float32),
        grid_spec=pltpu.PrefetchScalarGridSpec(
            num_scalar_prefetch=1,
            grid=(num_tiles,),
            in_specs=[
                pl.BlockSpec((v_rows, v_pad), lambda i, idx_s: (0, 0)),  # table (resident)
            ],
            out_specs=pl.BlockSpec((tn, v_pad), lambda i, idx_s: (i, 0)),
        ),
        compiler_params=_compiler_params(tn, v_pad, v_rows),
    )(idx_flat, table_p)

    return logits_pad[:N, :V].reshape(B, T, V)


def naive_language_model_forward(idx, table, targets=None, tile_rows=None):
    """Mirrors NaiveLanguageModel.forward(idx, targets).

    targets is None -> (logits (B, T, V), None)
    targets given   -> (logits (B*T, V), mean cross-entropy loss), as in PyTorch.
    """
    if targets is None:
        return _nlm_logits_impl(idx, table, tile_rows=tile_rows), None
    return _nlm_loss_impl(idx, targets, table, tile_rows=tile_rows)


# TODO(synk): generate() (torch.multinomial autoregressive sampling loop) is
# host-side control flow around forward(); not implemented as a kernel.


if __name__ == "__main__":
    def _check(vocab, b, t, tile_rows):
        key = jax.random.PRNGKey(0)
        k_tab, k_idx, k_tgt = jax.random.split(key, 3)
        table = jax.random.normal(k_tab, (vocab, vocab), dtype=jnp.float32)
        idx = jax.random.randint(k_idx, (b, t), 0, vocab, dtype=jnp.int32)
        targets = jax.random.randint(k_tgt, (b, t), 0, vocab, dtype=jnp.int32)

        # training path (logits + loss)
        logits, loss = naive_language_model_forward(idx, table, targets,
                                                    tile_rows=tile_rows)
        logits, loss = jax.block_until_ready((logits, loss))

        ref = table[idx].reshape(b * t, vocab)
        ref_loss = jnp.mean(jax.nn.logsumexp(ref, axis=-1)
                            - ref[jnp.arange(b * t), targets.reshape(-1)])
        assert logits.shape == (b * t, vocab)
        assert jnp.allclose(logits, ref, atol=1e-6), "logits mismatch"
        assert jnp.allclose(loss, ref_loss, atol=1e-5, rtol=1e-5), "loss mismatch"

        # inference path (targets=None -> loss is None, logits keep (B, T, V))
        logits_only, no_loss = naive_language_model_forward(idx, table, None,
                                                            tile_rows=tile_rows)
        jax.block_until_ready(logits_only)
        assert no_loss is None
        assert logits_only.shape == (b, t, vocab)
        assert jnp.allclose(logits_only, table[idx], atol=1e-6), "inference mismatch"

    _check(vocab=128, b=2, t=8, tile_rows=8)     # multi-tile grid, lane-dense vocab
    _check(vocab=96, b=2, t=8, tile_rows=None)   # exercises vocab padding to 128
    print("KERNEL_OK")
</pallas_src>

<mosaic_0001>
module attributes {stable_mosaic.version = 11 : i64} {
  func.func @_loss_kernel(%arg0: i32, %arg1: memref<16xi32, #tpu.memory_space<smem>>, %arg2: memref<8x1xi32, #tpu.memory_space<vmem>>, %arg3: memref<128x128xf32, #tpu.memory_space<vmem>>, %arg4: memref<8x128xf32, #tpu.memory_space<vmem>>, %arg5: memref<8x1xf32, #tpu.memory_space<vmem>>) attributes {dimension_semantics = [#tpu.dimension_semantics<parallel>], iteration_bounds = array<i64: 2>, scalar_prefetch = 1 : i64, scratch_operands = 0 : i64, tpu.core_type = #tpu.core_type<tc>, window_params = [{transform_indices = @transform_0, window_bounds = array<i64: 8, 1>}, {pipeline_mode = #tpu.pipeline_mode<synchronous>, transform_indices = @transform_1, window_bounds = array<i64: 128, 128>}, {transform_indices = @transform_2, window_bounds = array<i64: 8, 128>}, {transform_indices = @transform_3, window_bounds = array<i64: 8, 1>}]} {
    %c8_i32 = arith.constant 8 : i32
    %0 = arith.muli %arg0, %c8_i32 : i32
    %c0_i32 = arith.constant 0 : i32
    %1 = arith.addi %0, %c0_i32 : i32
    %2 = arith.index_cast %1 : i32 to index
    %3 = memref.load %arg1[%2] : memref<16xi32, #tpu.memory_space<smem>>
    %4 = arith.index_cast %3 : i32 to index
    %c0 = arith.constant 0 : index
    %5 = vector.load %arg3[%4, %c0] : memref<128x128xf32, #tpu.memory_space<vmem>>, vector<1x128xf32>
    %6 = arith.index_cast %c0_i32 : i32 to index
    %c0_0 = arith.constant 0 : index
    %7 = vector.load %arg4[%6, %c0_0] : memref<8x128xf32, #tpu.memory_space<vmem>>, vector<1x128xf32>
    tpu.vector_store %arg4[%6, %c0_0], %5 {strides = array<i32>} : memref<8x128xf32, #tpu.memory_space<vmem>>, vector<1x128xf32>,
    %c1_i32 = arith.constant 1 : i32
    %8 = arith.addi %0, %c1_i32 : i32
    %9 = arith.index_cast %8 : i32 to index
    %10 = memref.load %arg1[%9] : memref<16xi32, #tpu.memory_space<smem>>
    %11 = arith.index_cast %10 : i32 to index
    %c0_1 = arith.constant 0 : index
    %12 = vector.load %arg3[%11, %c0_1] : memref<128x128xf32, #tpu.memory_space<vmem>>, vector<1x128xf32>
    %13 = arith.index_cast %c1_i32 : i32 to index
    %c0_2 = arith.constant 0 : index
    %14 = vector.load %arg4[%13, %c0_2] : memref<8x128xf32, #tpu.memory_space<vmem>>, vector<1x128xf32>
    tpu.vector_store %arg4[%13, %c0_2], %12 {strides = array<i32>} : memref<8x128xf32, #tpu.memory_space<vmem>>, vector<1x128xf32>,
    %c2_i32 = arith.constant 2 : i32
    %15 = arith.addi %0, %c2_i32 : i32
    %16 = arith.index_cast %15 : i32 to index
    %17 = memref.load %arg1[%16] : memref<16xi32, #tpu.memory_space<smem>>
    %18 = arith.index_cast %17 : i32 to index
    %c0_3 = arith.constant 0 : index
    %19 = vector.load %arg3[%18, %c0_3] : memref<128x128xf32, #tpu.memory_space<vmem>>, vector<1x128xf32>
    %20 = arith.index_cast %c2_i32 : i32 to index
    %c0_4 = arith.constant 0 : index
    %21 = vector.load %arg4[%20, %c0_4] : memref<8x128xf32, #tpu.memory_space<vmem>>, vector<1x128xf32>
    tpu.vector_store %arg4[%20, %c0_4], %19 {strides = array<i32>} : memref<8x128xf32, #tpu.memory_space<vmem>>, vector<1x128xf32>,
    %c3_i32 = arith.constant 3 : i32
    %22 = arith.addi %0, %c3_i32 : i32
    %23 = arith.index_cast %22 : i32 to index
    %24 = memref.load %arg1[%23] : memref<16xi32, #tpu.memory_space<smem>>
    %25 = arith.index_cast %24 : i32 to index
    %c0_5 = arith.constant 0 : index
    %26 = vector.load %arg3[%25, %c0_5] : memref<128x128xf32, #tpu.memory_space<vmem>>, vector<1x128xf32>
    %27 = arith.index_cast %c3_i32 : i32 to index
    %c0_6 = arith.constant 0 : index
    %28 = vector.load %arg4[%27, %c0_6] : memref<8x128xf32, #tpu.memory_space<vmem>>, vector<1x128xf32>
    tpu.vector_store %arg4[%27, %c0_6], %26 {strides = array<i32>} : memref<8x128xf32, #tpu.memory_space<vmem>>, vector<1x128xf32>,
    %c4_i32 = arith.constant 4 : i32
    %29 = arith.addi %0, %c4_i32 : i32
    %30 = arith.index_cast %29 : i32 to index
    %31 = memref.load %arg1[%30] : memref<16xi32, #tpu.memory_space<smem>>
    %32 = arith.index_cast %31 : i32 to index
    %c0_7 = arith.constant 0 : index
    %33 = vector.load %arg3[%32, %c0_7] : memref<128x128xf32, #tpu.memory_space<vmem>>, vector<1x128xf32>
    %34 = arith.index_cast %c4_i32 : i32 to index
    %c0_8 = arith.constant 0 : index
    %35 = vector.load %arg4[%34, %c0_8] : memref<8x128xf32, #tpu.memory_space<vmem>>, vector<1x128xf32>
    tpu.vector_store %arg4[%34, %c0_8], %33 {strides = array<i32>} : memref<8x128xf32, #tpu.memory_space<vmem>>, vector<1x128xf32>,
    %c5_i32 = arith.constant 5 : i32
    %36 = arith.addi %0, %c5_i32 : i32
    %37 = arith.index_cast %36 : i32 to index
    %38 = memref.load %arg1[%37] : memref<16xi32, #tpu.memory_space<smem>>
    %39 = arith.index_cast %38 : i32 to index
    %c0_9 = arith.constant 0 : index
    %40 = vector.load %arg3[%39, %c0_9] : memref<128x128xf32, #tpu.memory_space<vmem>>, vector<1x128xf32>
    %41 = arith.index_cast %c5_i32 : i32 to index
    %c0_10 = arith.constant 0 : index
    %42 = vector.load %arg4[%41, %c0_10] : memref<8x128xf32, #tpu.memory_space<vmem>>, vector<1x128xf32>
    tpu.vector_store %arg4[%41, %c0_10], %40 {strides = array<i32>} : memref<8x128xf32, #tpu.memory_space<vmem>>, vector<1x128xf32>,
    %c6_i32 = arith.constant 6 : i32
    %43 = arith.addi %0, %c6_i32 : i32
    %44 = arith.index_cast %43 : i32 to index
    %45 = memref.load %arg1[%44] : memref<16xi32, #tpu.memory_space<smem>>
    %46 = arith.index_cast %45 : i32 to index
    %c0_11 = arith.constant 0 : index
    %47 = vector.load %arg3[%46, %c0_11] : memref<128x128xf32, #tpu.memory_space<vmem>>, vector<1x128xf32>
    %48 = arith.index_cast %c6_i32 : i32 to index
    %c0_12 = arith.constant 0 : index
    %49 = vector.load %arg4[%48, %c0_12] : memref<8x128xf32, #tpu.memory_space<vmem>>, vector<1x128xf32>
    tpu.vector_store %arg4[%48, %c0_12], %47 {strides = array<i32>} : memref<8x128xf32, #tpu.memory_space<vmem>>, vector<1x128xf32>,
    %c7_i32 = arith.constant 7 : i32
    %50 = arith.addi %0, %c7_i32 : i32
    %51 = arith.index_cast %50 : i32 to index
    %52 = memref.load %arg1[%51] : memref<16xi32, #tpu.memory_space<smem>>
    %53 = arith.index_cast %52 : i32 to index
    %c0_13 = arith.constant 0 : index
    %54 = vector.load %arg3[%53, %c0_13] : memref<128x128xf32, #tpu.memory_space<vmem>>, vector<1x128xf32>
    %55 = arith.index_cast %c7_i32 : i32 to index
    %c0_14 = arith.constant 0 : index
    %56 = vector.load %arg4[%55, %c0_14] : memref<8x128xf32, #tpu.memory_space<vmem>>, vector<1x128xf32>
    tpu.vector_store %arg4[%55, %c0_14], %54 {strides = array<i32>} : memref<8x128xf32, #tpu.memory_space<vmem>>, vector<1x128xf32>,
    %c8_i32_15 = arith.constant 8 : i32
    %c0_16 = arith.constant 0 : index
    %c0_17 = arith.constant 0 : index
    %57 = vector.load %arg4[%c0_16, %c0_17] : memref<8x128xf32, #tpu.memory_space<vmem>>, vector<8x128xf32>
    %c0_18 = arith.constant 0 : index
    %c0_19 = arith.constant 0 : index
    %58 = vector.load %arg2[%c0_18, %c0_19] : memref<8x1xi32, #tpu.memory_space<vmem>>, vector<8x1xi32>
    %59 = tpu.iota {dimensions = array<i32: 1>} : vector<8x128xi32>
    %cst = arith.constant dense<0xFF800000> : vector<8xf32>
    %60 = vector.multi_reduction <maximumf>, %57, %cst [1] : vector<8x128xf32> to vector<8xf32>
    %61 = vector.shape_cast %60 : vector<8xf32> to vector<8x1xf32>
    %62 = vector.broadcast %61 : vector<8x1xf32> to vector<8x128xf32>
    %63 = arith.subf %57, %62 : vector<8x128xf32>
    %64 = math.exp %63 : vector<8x128xf32>
    %cst_20 = arith.constant dense<0.000000e+00> : vector<8xf32>
    %65 = vector.multi_reduction <add>, %64, %cst_20 [1] : vector<8x128xf32> to vector<8xf32>
    %66 = vector.shape_cast %65 : vector<8xf32> to vector<8x1xf32>
    %67 = math.log %66 : vector<8x1xf32>
    %68 = arith.addf %67, %61 : vector<8x1xf32>
    %69 = vector.broadcast %58 : vector<8x1xi32> to vector<8x128xi32>
    %70 = arith.cmpi eq, %59, %69 : vector<8x128xi32>
    %cst_21 = arith.constant 0.000000e+00 : f32
    %71 = vector.broadcast %cst_21 : f32 to vector<8x128xf32>
    %72 = arith.select %70, %57, %71 : vector<8x128xi1>, vector<8x128xf32>
    %cst_22 = arith.constant dense<0.000000e+00> : vector<8xf32>
    %73 = vector.multi_reduction <add>, %72, %cst_22 [1] : vector<8x128xf32> to vector<8xf32>
    %74 = vector.shape_cast %73 : vector<8xf32> to vector<8x1xf32>
    %75 = arith.subf %68, %74 : vector<8x1xf32>
    %c0_23 = arith.constant 0 : index
    %c0_24 = arith.constant 0 : index
    %76 = vector.load %arg5[%c0_23, %c0_24] : memref<8x1xf32, #tpu.memory_space<vmem>>, vector<8x1xf32>
    tpu.vector_store %arg5[%c0_23, %c0_24], %75 {strides = array<i32>} : memref<8x1xf32, #tpu.memory_space<vmem>>, vector<8x1xf32>,
    return
  }
  func.func @transform_0(%arg0: i32, %arg1: memref<16xi32, #tpu.memory_space<smem>>) -> (i32, i32) {
    %c0_i32 = arith.constant 0 : i32
    %c0_i32_0 = arith.constant 0 : i32
    return %arg0, %c0_i32 : i32, i32
  }
  func.func @transform_1(%arg0: i32, %arg1: memref<16xi32, #tpu.memory_space<smem>>) -> (i32, i32) {
    %c0_i32 = arith.constant 0 : i32
    %c0_i32_0 = arith.constant 0 : i32
    %c0_i32_1 = arith.constant 0 : i32
    return %c0_i32, %c0_i32_0 : i32, i32
  }
  func.func @transform_2(%arg0: i32, %arg1: memref<16xi32, #tpu.memory_space<smem>>) -> (i32, i32) {
    %c0_i32 = arith.constant 0 : i32
    %c0_i32_0 = arith.constant 0 : i32
    return %arg0, %c0_i32 : i32, i32
  }
  func.func @transform_3(%arg0: i32, %arg1: memref<16xi32, #tpu.memory_space<smem>>) -> (i32, i32) {
    %c0_i32 = arith.constant 0 : i32
    %c0_i32_0 = arith.constant 0 : i32
    return %arg0, %c0_i32 : i32, i32
  }
}

</mosaic_0001>

<bundles_post_ra>
// kernel: _nlm_loss_impl.1
= control target key start
LH: loop header
LB: loop body
LE: loop exit
PB: predicated region body
PF: predicated region fallthrough
CT: control target
= control target key end

     0   :  { %s732_s0 = inlined_call_operand.vmem [shape: s32[16], index: 0, kind: input, shape index: {}]   ;;  %s733_s1 = inlined_call_operand.vmem [shape: s32[16,1], index: 1, kind: input, shape index: {}]   ;;  %s734_s2 = inlined_call_operand.hbm [shape: f32[128,128], index: 2, kind: input, shape index: {}]   ;;  %s735_s3 = inlined_call_operand.hbm [shape: f32[16,128], index: 3, kind: output, shape index: {0}]   ;;  %s736_s4 = inlined_call_operand.vmem [shape: f32[16,1], index: 4, kind: output, shape index: {1}]  }
   0x1   :  { %s10_s17 = sshll.u32 %s732_s0, 4  ;;  %s11_s17 = int_to_ptr.vmem [resolvable:$true] %s10_s17 }
   0x2   :  { %s460_s18 = scalar_lea.vmem %s11_s17, 16  ;;  %p465_p1 = scmp.lt.s32.totalorder %s11_s17, %s11_s17 }
   0x3   :  { %p461_p0 = scmp.ne.s32.totalorder %s11_s17, %s460_s18  ;;  %p466_p2 = scmp.lt.s32.totalorder %s460_s18, %s460_s18 }
   0x5   :  { %p467_p3 = por %p466_p2, %p465_p1 }
   0x7   :  { %p468_p4 = pnand %p467_p3, %p461_p0 }
   0x9   :  { %471 = shalt.err (!%p468_p4)  }
   0xa   :  { %s566_s19 = smov [#allocation3]  }
   0xb   :  { %13 = dma.vmem_to_smem %s11_s17, 16, %s566_s19, [#allocation2] }
   0xc   :  { %540 = dma.done.wait [#allocation2], 16 }
   0xd   :  { %541 = vsyncadd [#allocation2], 4294967280 }
   0xe   :  { %15 = sfence }
   0xf   :  { %16 = vsyncpa [#allocation5], 0 }
  0x10   :  { %17 = vsyncpa [#allocation6], 0 }
  0x11   :  { %19 = vsyncpa [#allocation6 + $0x1], 0  ;;  %s600_s20 = smov 0   ;;  %s602_s21 = smov 0  }
  0x12   :  { %s604_s0 = smov 0   ;;  %s606_s22 = smov 0  }
  0x13 LB: > { %s621_s23 = sadd.s32 4294967295, %s564_s22   ;;  %s387_s24 = sadd.s32 4294967294, %s564_s22   ;;  %s564_s22 = sphi %s606_s22, %s744_s22   ;;  %s560_s0 = sphi %s604_s0, %s743_s0   ;;  %s556_s21 = sphi %s602_s21, %s742_s21   ;;  %s552_s20 = sphi %s600_s20, %s741_s20  }
  0x14   : > { %s625_s25 = sadd.s32 1, %s564_s22   ;;  %s79_s26 = sadd.s32 1, %s560_s0 }
  0x15   : > { %s76_s27 = ssub.s32 %s564_s22, %s625_s25  ;;  %p89_p5 = scmp.ne.s32.totalorder %s560_s0, %s556_s21 }
  0x16   : > { %p77_p6 = scmp.eq.s32.totalorder %s76_s27, 0  ;;  %p90_p7 = scmp.eq.s32.totalorder %s621_s23, 1 }
  0x17   : > { %p95_p8 = scmp.ne.s32.totalorder %s556_s21, %s552_s20  ;;  %p96_p9 = scmp.eq.s32.totalorder %s387_s24, 1 }
  0x18   : > { %s636_s28 = scalar_select %p77_p6, %s560_s0, %s79_s26  }
  0x19   : > { %p638_p10 = por %p90_p7, %p89_p5  ;;  %p642_p11 = por %p96_p9, %p95_p8 }
  0x1a   : > { %p388_p12 = scmp.ge.s32.totalorder %s564_s22, 1  ;;  %p129_p13 = scmp.lt.s32.totalorder %s564_s22, 3 }
  0x1b   : > { %s738_s30 = scalar_select %p642_p11, 1, 0 }
  0x1c   : > { %p415_p0 = scmp.eq.s32.totalorder %s621_s23, 0  ;;  %p649_p1 = pnand %p388_p12, %p129_p13 }
  0x1d   : > { %s567_s6 = smov [#allocation4]  }
  0x1e   : > { %s141_s7 = sshll.u32 %s567_s6, 4  ;;  %p407_p2 = pneg %p649_p1  ;;  %s142_s7 = int_to_ptr.vmem [resolvable:$true] %s141_s7 }
  0x1f   : > { %s483_s8 = scalar_lea.vmem %s142_s7, 2048  ;;  %p491_p8 = scmp.lt.s32.totalorder %s142_s7, %s142_s7 }
  0x20   : > { %p408_p3 = pnand %p415_p0, %p407_p2  ;;  %p484_p5 = scmp.ne.s32.totalorder %s142_s7, %s483_s8 }
  0x21   : > { %p492_p9 = scmp.lt.s32.totalorder %s483_s8, %s483_s8 }
  0x22   : > { %p474_p4 = pneg %p408_p3 }
  0x23   : > { %p493_p11 = por %p492_p9, %p491_p8 }
  0x24   : > { %p486_p6 = pnand %p484_p5, %p474_p4 }
  0x26   : > { %p487_p7 = pneg %p486_p6 }
  0x28   : > { %p494_p12 = pnand %p493_p11, %p487_p7 }
  0x2a   : > { %497 = shalt.err (!%p494_p12)
}
  0x2b   : > { %s568_s9 = smov 128   ;;  %s569_s10 = smov 8  }
  0x2c   : > { %410 = dma.hbm_to_vmem [thread:$0]  (!%p408_p3), %s734_s2, 2048, %s142_s7, [#allocation5], %s568_s9, %s568_s9, %s569_s10  }
  0x2d   : > { %164 = sbr.rel (%p649_p1) target bundleno = 392 (0x188), region = 28 }
  0x32   : > { %543 = dma.done.wait (%p415_p0), [#allocation5], 2048  }
  0x33   : > { %545 = vsyncadd (%p415_p0), [#allocation5], 4294965248  ;;  %s182_s13 = sand.u32 1, %s556_s21   ;;  %s396_s14 = sshll.u32 %s621_s23, 3  ;;  %v570_v0 = vmov 0   ;;  %v241_v14 = vlaneseq }
  0x34   : > { %s393_s15 = sshll.u32 %s182_s13, 3  ;;  %s200_s16 = sld [smem:[#allocation3 + %s396_s14]]  ;;  %455 = vset.pattern.permute.xlu0 %v570_v0 }
  0x35   : > { %s204_s17 = sadd.s32 1, %s396_s14  ;;  %s209_s19 = sadd.s32 2, %s396_s14  ;;  %v242_v15 = vand.u32 127, %v241_v14 }
  0x36   : > { %s205_s18 = sld [smem:[#allocation3 + %s204_s17]]  ;;  %s214_s26 = sadd.s32 3, %s396_s14 }
  0x37   : > { %s210_s24 = sld [smem:[#allocation3 + %s209_s19]]  ;;  %s219_s5 = sadd.s32 4, %s396_s14 }
  0x38   : > { %s215_s27 = sld [smem:[#allocation3 + %s214_s26]]  ;;  %s224_s7 = sadd.s32 5, %s396_s14 }
  0x39   : > { %s220_s6 = sld [smem:[#allocation3 + %s219_s5]]  ;;  %s229_s10 = sadd.s32 6, %s396_s14 }
  0x3a   : > { %s225_s8 = sld [smem:[#allocation3 + %s224_s7]]  ;;  %s201_s9 = scalar_lea.vmem [#allocation4], %s200_s16 }
  0x3b   : > { %v202_v1 = vld [vmem:[%s201_s9] sm:$0x1]  ;;  %s234_s11 = sadd.s32 7, %s396_s14  ;;  %s670_s12 = scalar_lea.vmem [#allocation7], %s393_s15 }
  0x3c   : > { %203 = vst [vmem:[%s670_s12] sm:$0x1] %v202_v1  ;;  %s230_s17 = sld [smem:[#allocation3 + %s229_s10]]  ;;  %s206_s19 = scalar_lea.vmem [#allocation4], %s205_s18 }
  0x3d   : > { %v207_v2 = vld [vmem:[%s206_s19] sm:$0x1]  ;;  %s235_s26 = sld [smem:[#allocation3 + %s234_s11]]  ;;  %s211_s5 = scalar_lea.vmem [#allocation4], %s210_s24 }
  0x3e   : > { %208 = vst [vmem:[%s670_s12 + $0x1] sm:$0x1] %v207_v2  ;;  %v212_v3 = vld [vmem:[%s211_s5] sm:$0x1]  ;;  %s216_s14 = scalar_lea.vmem [#allocation4], %s215_s27  ;;  %p191_p11 = scmp.lt.s32.totalorder %s621_s23, 1 }
  0x3f   : > { %213 = vst [vmem:[%s670_s12 + $0x2] sm:$0x1] %v212_v3  ;;  %v217_v4 = vld [vmem:[%s216_s14] sm:$0x1]  ;;  %s221_s15 = scalar_lea.vmem [#allocation4], %s220_s6  ;;  %s398_s10 = sshll.u32 %s621_s23, 7 }
  0x40   : > { %218 = vst [vmem:[%s670_s12 + $0x3] sm:$0x1] %v217_v4  ;;  %v222_v5 = vld [vmem:[%s221_s15] sm:$0x1]  ;;  %s226_s16 = scalar_lea.vmem [#allocation4], %s225_s8  ;;  %s281_s11 = sshll.u32 %s670_s12, 4  ;;  %s282_s11 = int_to_ptr.vmem [resolvable:$true] %s281_s11 }
  0x41   : > { %223 = vst [vmem:[%s670_s12 + $0x4] sm:$0x1] %v222_v5  ;;  %v227_v6 = vld [vmem:[%s226_s16] sm:$0x1]  ;;  %s683_s24 = scalar_select %p191_p11, %s621_s23, 1 }
  0x42   : > { %228 = vst [vmem:[%s670_s12 + $0x5] sm:$0x1] %v227_v6  ;;  %s231_s18 = scalar_lea.vmem [#allocation4], %s230_s17  ;;  %s264_s5 = scalar_lea.sflag [#allocation6], %s182_s13 }
  0x43   : > { %v232_v7 = vld [vmem:[%s231_s18] sm:$0x1]  ;;  %s236_s7 = scalar_lea.vmem [#allocation4], %s235_s26  ;;  %s394_s27 = sshll.u32 %s683_s24, 3 }
  0x44   : > { %233 = vst [vmem:[%s670_s12 + $0x6] sm:$0x1] %v232_v7  ;;  %v237_v8 = vld [vmem:[%s236_s7] sm:$0x1]  ;;  %s194_s8 = scalar_lea.vmem %s733_s1, %s394_s27  ;;  %s279_s26 = scalar_lea.hbm %s735_s3, %s398_s10 }
  0x45   : > { %238 = vst [vmem:[%s670_s12 + $0x7] sm:$0x1] %v237_v8  ;;  %v240_v10 = vld [vmem:[%s194_s8] sm:$0xff]  ;;  %s498_s14 = scalar_lea.vmem %s282_s11, 128  ;;  %s571_s15 = smov [#allocation7]  }
  0x46   : > { %p499_p13 = scmp.ne.s32.totalorder %s282_s11, %s498_s14  ;;  %s502_s16 = sshll.u32 %s571_s15, 4  ;;  %s503_s16 = int_to_ptr.vmem [resolvable:$false] %s502_s16 }
  0x47   : > { %s504_s18 = scalar_lea.vmem %s503_s16, 256  ;;  %p505_p2 = scmp.lt.s32.totalorder %s282_s11, %s503_s16 }
  0x48   : > { %p500_p0 = pnand %p499_p13, %p638_p10  ;;  %p506_p3 = scmp.lt.s32.totalorder %s504_s18, %s498_s14 }
  0x4a   : > { %p501_p1 = pneg %p500_p0  ;;  %p507_p4 = por %p506_p3, %p505_p2 }
  0x4c   : > { %v239_v9 = vld [vmem:[%s670_s12] sm:$0xff]  ;;  %p508_p5 = pnand %p507_p4, %p501_p1 }
  0x4d   : > { %243 = vmax.xlane.f32.xlu0 %v239_v9 }
  0x63   : > { %254 = vperm.xlu0 %455, %v240_v10  }
  0xd6   : > { %v244_v11 = vpop.xlane.xlu0 %243 }
  0xd7   : > { %v245_v12 = vsub.f32 %v239_v9, %v244_v11 }
  0xd9   : > { %v246_v13 = vmul.f32 1.442695, %v245_v12 }
  0xdb   : > { %456 = vpow2.f32 %v246_v13 }
  0xde   : > { %v255_v16 = vpop.permute.xlu0 %254 }
  0xdf   : > { %vm256_vm0 = vcmp.eq.s32.totalorder %v242_v15, %v255_v16 }
  0xe0   : > { %v257_v18 = vsel %vm256_vm0, %v239_v9, 0.0 }
  0xe8   : > { %v457_v17 = vpop.eup %456 }
  0xe9   : > { %248 = vadd.xlane.f32.xlu1 %v457_v17 }
  0xed   : > { %258 = vadd.xlane.f32.xlu1 %v257_v18 }
  0xee   : > { %511 = shalt.err (!%p508_p5)
}
  0xef   : > { %s512_s23 = scalar_lea.hbm %s279_s26, 128  ;;  %s516_s7 = scalar_lea.hbm %s735_s3, 256 }
  0xf0   : > { %p513_p6 = scmp.ne.s32.totalorder %s279_s26, %s512_s23  ;;  %p517_p9 = scmp.lt.s32.totalorder %s279_s26, %s735_s3 }
  0xf1   : > { %p518_p12 = scmp.lt.s32.totalorder %s516_s7, %s512_s23 }
  0xf2   : > { %p514_p7 = pnand %p513_p6, %p638_p10 }
  0xf3   : > { %p519_p11 = por %p518_p12, %p517_p9 }
  0xf4   : > { %p515_p8 = pneg %p514_p7 }
  0xf6   : > { %p520_p13 = pnand %p519_p11, %p515_p8 }
  0xf8   : > { %523 = shalt.err (!%p520_p13)
}
  0xf9   : > { %405 = dma.vmem_to_hbm [thread:$0]  (%p638_p10), %s282_s11, 128, %s279_s26, %s264_s5   ;;  %vm261_vm1 = vcmask 7168  }
  0xfa   : > { %s198_s17 = scalar_lea.vmem %s736_s4, %s394_s27 }
 0x172   : > { %v249_v19 = vpop.xlane.xlu1 %248 }
 0x173   : > { %458 = vlog2.f32 %v249_v19 }
 0x176   : > { %v259_v22 = vpop.xlane.xlu1 %258 }
 0x180   : > { %v459_v20 = vpop.eup %458 }
 0x181   : > { %v251_v21 = vmul.f32 0.6931472, %v459_v20 }
 0x183   : > { %v252_v23 = vadd.f32 %v251_v21, %v244_v11 }
 0x185   : > { %v260_v24 = vsub.f32 %v252_v23, %v259_v22 }
 0x187   : > { %262 = vst.msk [vmem:[%s198_s17] sm:$0xff] %vm261_vm1, %v260_v24 }
 0x188 PF: > { %p417_p0 = scmp.ge.s32.totalorder %s564_s22, 2  ;;  %s296_s29 = sand.u32 1, %s552_s20  }
 0x189   : > { %p740_p10 = scmp.ne.s32.totalorder %s738_s30, 0  ;;  %s297_s11 = scalar_lea.sflag [#allocation6], %s296_s29 }
 0x18b   : > { %p412_p1 = pnand %p417_p0, %p740_p10 }
 0x18d   : > { %p413_p2 = pneg %p412_p1 }
 0x18f   : > { %547 = dma.done.wait (%p413_p2), %s297_s11, 128  }
 0x190   : > { %549 = vsyncadd (%p413_p2), %s297_s11, 4294967168  ;;  %p22_p3 = scmp.ge.s32.totalorder %s625_s25, 4   ;;  %s741_s20 = smov %s556_s21 }
 0x191   : > { %s742_s21 = smov %s560_s0  ;;  %s743_s0 = smov %s636_s28 }
 0x192   : > { %s744_s22 = smov %s625_s25  ;;  %24 = sbr.rel (!%p22_p3) target bundleno = 19 (0x13), region = 88 }
 0x197   :  { %309 = vsyncpa [#allocation5], 1 }
 0x198   :  { %311 = vsyncpa [#allocation5 + $0x1], 1 }
 0x199   :  { %312 = vsyncpa [#allocation6], 1 }
 0x19a   :  { %314 = vsyncpa [#allocation6 + $0x1], 1 }

</bundles_post_ra>
